<compile_context>
chip_gen: v5e
topology: v5e:2x2
jax: 0.10.0
libtpu: 0.0.40
codegen_flags: <defaults>
</compile_context>

<pallas_src>
import jax
import jax.numpy as jnp
from jax.experimental import pallas as pl
from jax.experimental.pallas import tpu as pltpu


MAX_NORM = 1.0
_VMEM_LIMIT = 32 * 1024 * 1024    # explicit scoped-VMEM limit; safe on v5e/v6e/v7x
_TILE_BUDGET = 20 * 1024 * 1024   # double-buffered working-set budget (headroom vs limit)
_LANE = 128


# ---------------------------------------------------------------------------
# Tile selection (padding-aware, megacore-friendly)
# ---------------------------------------------------------------------------
def _block_col_bytes(operands):
    """Double-buffered VMEM bytes per lane column of the kernel's blocks.

    `operands` is a list of (leading_elems, second_minor, dtype).  A block
    shaped (leading..., second_minor, tile) costs
        leading * round_up(second_minor, sublane_multiple(dtype)) * itemsize
    bytes per lane column; the auto-pipeline double-buffers each operand.
    """
    total = 0
    for lead, second_minor, dtype in operands:
        itemsize = jnp.dtype(dtype).itemsize
        sub = max(8 * 4 // itemsize, 8)          # f32 -> 8, bf16 -> 16, i8 -> 32
        padded = -(-second_minor // sub) * sub
        total += lead * padded * itemsize
    return 2 * total                             # x2 for double buffering


def _pick_tile(n, col_bytes, *, budget_bytes=_TILE_BUDGET, cap=4096, min_steps=2):
    """Largest lane-axis tile (multiple of 128) whose double-buffered working
    set fits the VMEM budget, capped so the grid has >= min_steps steps (so the
    'parallel' axis can shard across v7x's two TensorCores)."""
    t = min(cap, budget_bytes // max(col_bytes, 1))
    t = min(t, -(-n // min_steps))               # ceil(n / min_steps)
    t = (t // _LANE) * _LANE                     # lane-aligned tile
    if t < _LANE or t >= n:
        return n                                 # single full-extent block
    return t


# ---------------------------------------------------------------------------
# Pallas kernels
# ---------------------------------------------------------------------------
def _renorm_cols_kernel(w_ref, out_ref):
    """nn.Embedding(max_norm=1) renormalisation, column-wise on a (K, tile)
    block of the transposed table; rsqrt-based scale (EUP slot)."""
    w = w_ref[...].astype(jnp.float32)                        # (K, TE)
    sumsq = jnp.sum(w * w, axis=0, keepdims=True)             # (1, TE)
    scale = jnp.where(sumsq > MAX_NORM * MAX_NORM,
                      MAX_NORM * jax.lax.rsqrt(sumsq), 1.0)
    out_ref[...] = (w * scale).astype(out_ref.dtype)


def _hop_kernel(ent_ref, tgt_ref, out_ref):
    """One GNN hop for a lane-tile of nodes (attention is a forward no-op:
    softmax over a size-1 axis == 1, so out == FMaggregator(ent) + tgt)."""
    ent = ent_ref[...].astype(jnp.float32)                    # (M, K, TN)
    tgt = tgt_ref[...].astype(jnp.float32)                    # (K, TN)
    s = jnp.sum(ent, axis=0)                                  # VPU adds over M
    agg = s * s - jnp.sum(ent * ent, axis=0)                  # FMaggregator
    out_ref[...] = (agg + tgt).astype(out_ref.dtype)


def _hop_pred_kernel(ent_ref, tgt_ref, usr_ref, out_ref):
    """Final hop fused with the prediction head:
         item  = FMaggregator(ent) + tgt
         logit = sigmoid(sum_K(user * item))   -> lane-dense (1, TB) output."""
    ent = ent_ref[...].astype(jnp.float32)                    # (M, K, TB)
    tgt = tgt_ref[...].astype(jnp.float32)                    # (K, TB)
    usr = usr_ref[...].astype(jnp.float32)                    # (K, TB)
    s = jnp.sum(ent, axis=0)
    item = s * s - jnp.sum(ent * ent, axis=0) + tgt           # (K, TB)
    uv = jnp.sum(usr * item, axis=0, keepdims=True)           # (1, TB)
    out_ref[...] = (1.0 / (1.0 + jnp.exp(-uv))).astype(out_ref.dtype)


# ---------------------------------------------------------------------------
# pallas_call wrappers
# ---------------------------------------------------------------------------
def renorm_table_forward(w_t, *, tile_e=None):
    """Renorm a transposed (K, E) embedding table once; emits bf16."""
    K, E = w_t.shape
    if tile_e is None:
        tile_e = _pick_tile(E, _block_col_bytes([(1, K, w_t.dtype),
                                                 (1, K, jnp.bfloat16)]))
    return pl.pallas_call(
        _renorm_cols_kernel,
        out_shape=jax.ShapeDtypeStruct((K, E), jnp.bfloat16),
        grid=(pl.cdiv(E, tile_e),),
        in_specs=[pl.BlockSpec((K, tile_e), lambda i: (0, i))],
        out_specs=pl.BlockSpec((K, tile_e), lambda i: (0, i)),
        compiler_params=pltpu.CompilerParams(
            dimension_semantics=("parallel",),
            vmem_limit_bytes=_VMEM_LIMIT,
        ),
    )(w_t)


def hop_forward(entity_embs, target_embs, *, tile_n=None):
    """One hop over a lane-tiled node axis.
       entity_embs: (M, K, N)   target_embs: (K, N)   ->  (K, N) bf16."""
    M, K, N = entity_embs.shape
    if tile_n is None:
        tile_n = _pick_tile(N, _block_col_bytes([
            (M, K, entity_embs.dtype),
            (1, K, target_embs.dtype),
            (1, K, jnp.bfloat16)]))
    return pl.pallas_call(
        _hop_kernel,
        out_shape=jax.ShapeDtypeStruct((K, N), jnp.bfloat16),
        grid=(pl.cdiv(N, tile_n),),
        in_specs=[
            pl.BlockSpec((M, K, tile_n), lambda i: (0, 0, i)),
            pl.BlockSpec((K, tile_n), lambda i: (0, i)),
        ],
        out_specs=pl.BlockSpec((K, tile_n), lambda i: (0, i)),
        compiler_params=pltpu.CompilerParams(
            dimension_semantics=("parallel",),
            vmem_limit_bytes=_VMEM_LIMIT,
        ),
    )(entity_embs, target_embs)


def hop_pred_forward(entity_embs, target_embs, user_embs, *, tile_b=None):
    """Final hop fused with the prediction head.
       entity_embs: (M, K, B)   target/user: (K, B)   ->  (B,) f32 logits."""
    M, K, B = entity_embs.shape
    if tile_b is None:
        tile_b = _pick_tile(B, _block_col_bytes([
            (M, K, entity_embs.dtype),
            (1, K, target_embs.dtype),
            (1, K, user_embs.dtype),
            (1, 1, jnp.float32)]))
    out = pl.pallas_call(
        _hop_pred_kernel,
        out_shape=jax.ShapeDtypeStruct((1, B), jnp.float32),
        grid=(pl.cdiv(B, tile_b),),
        in_specs=[
            pl.BlockSpec((M, K, tile_b), lambda i: (0, 0, i)),
            pl.BlockSpec((K, tile_b), lambda i: (0, i)),
            pl.BlockSpec((K, tile_b), lambda i: (0, i)),
        ],
        out_specs=pl.BlockSpec((1, tile_b), lambda i: (0, i)),
        compiler_params=pltpu.CompilerParams(
            dimension_semantics=("parallel",),
            vmem_limit_bytes=_VMEM_LIMIT,
        ),
    )(entity_embs, target_embs, user_embs)
    return out[0]                                  # (B,), lane-dense writeback


# ---------------------------------------------------------------------------
# Plain-JAX glue (graph-structured gathers only; all math is in the kernels)
# ---------------------------------------------------------------------------
def init_params(key, n_users, n_entitys, k_dim, t_dim):
    k = jax.random.split(key, 6)
    # Embedding tables stored TRANSPOSED (k_dim, n) so XLA gathers produce the
    # lane-dense (K, N) / (M, K, N) layout the kernels consume (no transposes).
    entity_w_t = jax.random.normal(k[0], (k_dim, n_entitys), jnp.float32)
    user_w_t = jax.random.normal(k[1], (k_dim, n_users), jnp.float32)
    # a_liner / h_liner exist in the module but do not affect the forward output
    # (softmax over a size-1 axis is identically 1) - kept for parity only.
    ba = 1.0 / float(k_dim) ** 0.5
    a_w = jax.random.uniform(k[2], (k_dim, t_dim), jnp.float32, -ba, ba)
    a_b = jax.random.uniform(k[3], (1, t_dim), jnp.float32, -ba, ba)
    bh = 1.0 / float(t_dim) ** 0.5
    h_w = jax.random.uniform(k[4], (1, t_dim), jnp.float32, -bh, bh)
    h_b = jax.random.uniform(k[5], (1, 1), jnp.float32, -bh, bh)
    return entity_w_t, user_w_t, a_w, a_b, h_w, h_b


def gafm_item_forward(params, u, items, level1_nodes, hop0_values, hop1_pos,
                      *, tile_n=None, tile_b=None):
    entity_w_t, user_w_t, *_unused_attention_params = params

    # max_norm=1 renorm applied ONCE to the small tables (not per gathered row);
    # bf16 output halves the bytes of every downstream gather.
    ent_tab = renorm_table_forward(entity_w_t)             # (K, E) bf16
    usr_tab = renorm_table_forward(user_w_t)               # (K, U) bf16

    M = hop0_values.shape[1]

    # ---- hop 0: aggregate raw entity neighbors into each level-1 node ----
    # One XLA gather per neighbor slot, emitted directly in the lane-dense
    # (M, K, N) layout (stack along a new leading axis = no minor-dim shuffle).
    ent0 = jnp.stack([jnp.take(ent_tab, hop0_values[:, m], axis=1)
                      for m in range(M)], axis=0)          # (M, K, N1) bf16
    tgt0 = jnp.take(ent_tab, level1_nodes, axis=1)         # (K, N1)    bf16
    agg0 = hop_forward(ent0, tgt0, tile_n=tile_n)          # (K, N1)    bf16

    # ---- hop 1 (+ fused prediction head) ----
    ent1 = jnp.stack([jnp.take(agg0, hop1_pos[:, m], axis=1)
                      for m in range(M)], axis=0)          # (M, K, B) bf16
    tgt1 = jnp.take(ent_tab, items, axis=1)                # (K, B)    bf16
    usr_e = jnp.take(usr_tab, u, axis=1)                   # (K, B)    bf16
    return hop_pred_forward(ent1, tgt1, usr_e, tile_b=tile_b)   # (B,) f32


def _reference_forward(params, u, items, level1_nodes, hop0_values, hop1_pos):
    """Pure-JAX reference mirroring the kernel's bf16 rounding points."""
    entity_w_t, user_w_t, *_ = params

    def renorm_cols(w_t):
        w = w_t.astype(jnp.float32)
        ss = jnp.sum(w * w, axis=0, keepdims=True)
        scale = jnp.where(ss > MAX_NORM * MAX_NORM, MAX_NORM * jax.lax.rsqrt(ss), 1.0)
        return (w * scale).astype(jnp.bfloat16)

    def fm(ent):                                           # ent: (K, n, M)
        s = jnp.sum(ent, axis=-1)
        return s * s - jnp.sum(ent * ent, axis=-1)

    et = renorm_cols(entity_w_t)
    ut = renorm_cols(user_w_t)

    ent0 = et[:, hop0_values].astype(jnp.float32)          # (K, N1, M)
    tgt0 = et[:, level1_nodes].astype(jnp.float32)         # (K, N1)
    agg0 = (fm(ent0) + tgt0).astype(jnp.bfloat16)          # (K, N1) bf16

    ent1 = agg0[:, hop1_pos].astype(jnp.float32)           # (K, B, M)
    item = fm(ent1) + et[:, items].astype(jnp.float32)     # (K, B)
    uv = jnp.sum(ut[:, u].astype(jnp.float32) * item, axis=0)
    return 1.0 / (1.0 + jnp.exp(-uv))


# ---------------------------------------------------------------------------
# Main
# ---------------------------------------------------------------------------
if __name__ == "__main__":
    n_users, n_entitys = 64, 500
    k_dim, t_dim = 32, 16
    B, N1, M = 256, 320, 4       # batch items, level-1 nodes, neighbors per node

    key = jax.random.PRNGKey(0)
    kp, kg = jax.random.split(key)
    params = init_params(kp, n_users, n_entitys, k_dim, t_dim)

    ks = jax.random.split(kg, 5)
    # TODO(synk): synthetic deterministic GraphSAGE adjacency structure (the
    # original module builds this with pandas/NetworkX in the dataloader).
    level1_nodes = jax.random.permutation(ks[0], n_entitys)[:N1]        # (N1,)
    hop0_values = jax.random.randint(ks[1], (N1, M), 0, n_entitys)      # (N1, M)
    hop1_pos = jax.random.randint(ks[2], (B, M), 0, N1)                 # (B, M)
    items = jax.random.randint(ks[3], (B,), 0, n_entitys)               # (B,)
    u = jax.random.randint(ks[4], (B,), 0, n_users)                     # (B,)

    # Auto-picked tiles give multi-step, double-buffered grids at these shapes
    # (hop: 3 steps of 128 incl. a partial block; pred: 2 steps of 128).
    fwd = jax.jit(gafm_item_forward)
    logit = jax.block_until_ready(
        fwd(params, u, items, level1_nodes, hop0_values, hop1_pos))
    assert logit.shape == (B,)

    ref = jax.block_until_ready(
        _reference_forward(params, u, items, level1_nodes, hop0_values, hop1_pos))
    assert jnp.allclose(logit, ref, rtol=5e-3, atol=1e-3), (logit, ref)
    print("KERNEL_OK")
</pallas_src>

<mosaic_0001>
module attributes {stable_mosaic.version = 11 : i64} {
  func.func @_renorm_cols_kernel(%arg0: i32, %arg1: memref<32x128xf32, #tpu.memory_space<vmem>>, %arg2: memref<32x128xbf16, #tpu.memory_space<vmem>>) attributes {dimension_semantics = [#tpu.dimension_semantics<parallel>], iteration_bounds = array<i64: 4>, scalar_prefetch = 0 : i64, scratch_operands = 0 : i64, tpu.core_type = #tpu.core_type<tc>, window_params = [{transform_indices = @transform_0, window_bounds = array<i64: 32, 128>}, {transform_indices = @transform_1, window_bounds = array<i64: 32, 128>}]} {
    %c0 = arith.constant 0 : index
    %c0_0 = arith.constant 0 : index
    %0 = vector.load %arg1[%c0, %c0_0] : memref<32x128xf32, #tpu.memory_space<vmem>>, vector<32x128xf32>
    %1 = arith.mulf %0, %0 : vector<32x128xf32>
    %cst = arith.constant dense<0.000000e+00> : vector<128xf32>
    %2 = vector.multi_reduction <add>, %1, %cst [0] : vector<32x128xf32> to vector<128xf32>
    %3 = vector.shape_cast %2 : vector<128xf32> to vector<1x128xf32>
    %cst_1 = arith.constant 1.000000e+00 : f32
    %4 = vector.broadcast %cst_1 : f32 to vector<1x128xf32>
    %5 = arith.cmpf ogt, %3, %4 : vector<1x128xf32>
    %6 = math.rsqrt %3 : vector<1x128xf32>
    %cst_2 = arith.constant 1.000000e+00 : f32
    %7 = vector.broadcast %cst_2 : f32 to vector<1x128xf32>
    %8 = arith.mulf %7, %6 : vector<1x128xf32>
    %cst_3 = arith.constant 1.000000e+00 : f32
    %9 = vector.broadcast %cst_3 : f32 to vector<1x128xf32>
    %10 = arith.select %5, %8, %9 : vector<1x128xi1>, vector<1x128xf32>
    %11 = vector.broadcast %10 : vector<1x128xf32> to vector<32x128xf32>
    %12 = arith.mulf %0, %11 : vector<32x128xf32>
    %13 = arith.truncf %12 : vector<32x128xf32> to vector<32x128xbf16>
    %c0_4 = arith.constant 0 : index
    %c0_5 = arith.constant 0 : index
    %14 = vector.load %arg2[%c0_4, %c0_5] : memref<32x128xbf16, #tpu.memory_space<vmem>>, vector<32x128xbf16>
    tpu.vector_store %arg2[%c0_4, %c0_5], %13 {strides = array<i32>} : memref<32x128xbf16, #tpu.memory_space<vmem>>, vector<32x128xbf16>,
    return
  }
  func.func @transform_0(%arg0: i32) -> (i32, i32) {
    %c0_i32 = arith.constant 0 : i32
    %c0_i32_0 = arith.constant 0 : i32
    return %c0_i32, %arg0 : i32, i32
  }
  func.func @transform_1(%arg0: i32) -> (i32, i32) {
    %c0_i32 = arith.constant 0 : i32
    %c0_i32_0 = arith.constant 0 : i32
    return %c0_i32, %arg0 : i32, i32
  }
}

module attributes {stable_mosaic.version = 11 : i64} {
  func.func @_hop_kernel(%arg0: i32, %arg1: memref<4x32x128xbf16, #tpu.memory_space<vmem>>, %arg2: memref<32x128xbf16, #tpu.memory_space<vmem>>, %arg3: memref<32x128xbf16, #tpu.memory_space<vmem>>) attributes {dimension_semantics = [#tpu.dimension_semantics<parallel>], iteration_bounds = array<i64: 3>, scalar_prefetch = 0 : i64, scratch_operands = 0 : i64, tpu.core_type = #tpu.core_type<tc>, window_params = [{transform_indices = @transform_0, window_bounds = array<i64: 4, 32, 128>}, {transform_indices = @transform_1, window_bounds = array<i64: 32, 128>}, {transform_indices = @transform_2, window_bounds = array<i64: 32, 128>}]} {
    %c0 = arith.constant 0 : index
    %c0_0 = arith.constant 0 : index
    %c0_1 = arith.constant 0 : index
    %0 = vector.load %arg1[%c0, %c0_0, %c0_1] : memref<4x32x128xbf16, #tpu.memory_space<vmem>>, vector<4x32x128xbf16>
    %1 = arith.extf %0 : vector<4x32x128xbf16> to vector<4x32x128xf32>
    %c0_2 = arith.constant 0 : index
    %c0_3 = arith.constant 0 : index
    %2 = vector.load %arg2[%c0_2, %c0_3] : memref<32x128xbf16, #tpu.memory_space<vmem>>, vector<32x128xbf16>
    %3 = arith.extf %2 : vector<32x128xbf16> to vector<32x128xf32>
    %cst = arith.constant dense<0.000000e+00> : vector<32x128xf32>
    %4 = vector.multi_reduction <add>, %1, %cst [0] : vector<4x32x128xf32> to vector<32x128xf32>
    %5 = arith.mulf %4, %4 : vector<32x128xf32>
    %6 = arith.mulf %1, %1 : vector<4x32x128xf32>
    %cst_4 = arith.constant dense<0.000000e+00> : vector<32x128xf32>
    %7 = vector.multi_reduction <add>, %6, %cst_4 [0] : vector<4x32x128xf32> to vector<32x128xf32>
    %8 = arith.subf %5, %7 : vector<32x128xf32>
    %9 = arith.addf %8, %3 : vector<32x128xf32>
    %10 = arith.truncf %9 : vector<32x128xf32> to vector<32x128xbf16>
    %c0_5 = arith.constant 0 : index
    %c0_6 = arith.constant 0 : index
    %11 = vector.load %arg3[%c0_5, %c0_6] : memref<32x128xbf16, #tpu.memory_space<vmem>>, vector<32x128xbf16>
    tpu.vector_store %arg3[%c0_5, %c0_6], %10 {strides = array<i32>} : memref<32x128xbf16, #tpu.memory_space<vmem>>, vector<32x128xbf16>,
    return
  }
  func.func @transform_0(%arg0: i32) -> (i32, i32, i32) {
    %c0_i32 = arith.constant 0 : i32
    %c0_i32_0 = arith.constant 0 : i32
    %c0_i32_1 = arith.constant 0 : i32
    return %c0_i32, %c0_i32_0, %arg0 : i32, i32, i32
  }
  func.func @transform_1(%arg0: i32) -> (i32, i32) {
    %c0_i32 = arith.constant 0 : i32
    %c0_i32_0 = arith.constant 0 : i32
    return %c0_i32, %arg0 : i32, i32
  }
  func.func @transform_2(%arg0: i32) -> (i32, i32) {
    %c0_i32 = arith.constant 0 : i32
    %c0_i32_0 = arith.constant 0 : i32
    return %c0_i32, %arg0 : i32, i32
  }
}

module attributes {stable_mosaic.version = 11 : i64} {
  func.func @_renorm_cols_kernel(%arg0: i32, %arg1: memref<32x64xf32, #tpu.memory_space<vmem>>, %arg2: memref<32x64xbf16, #tpu.memory_space<vmem>>) attributes {dimension_semantics = [#tpu.dimension_semantics<parallel>], iteration_bounds = array<i64: 1>, scalar_prefetch = 0 : i64, scratch_operands = 0 : i64, tpu.core_type = #tpu.core_type<tc>, window_params = [{transform_indices = @transform_0, window_bounds = array<i64: 32, 64>}, {transform_indices = @transform_1, window_bounds = array<i64: 32, 64>}]} {
    %c0 = arith.constant 0 : index
    %c0_0 = arith.constant 0 : index
    %0 = vector.load %arg1[%c0, %c0_0] : memref<32x64xf32, #tpu.memory_space<vmem>>, vector<32x64xf32>
    %1 = arith.mulf %0, %0 : vector<32x64xf32>
    %cst = arith.constant dense<0.000000e+00> : vector<64xf32>
    %2 = vector.multi_reduction <add>, %1, %cst [0] : vector<32x64xf32> to vector<64xf32>
    %3 = vector.shape_cast %2 : vector<64xf32> to vector<1x64xf32>
    %cst_1 = arith.constant 1.000000e+00 : f32
    %4 = vector.broadcast %cst_1 : f32 to vector<1x64xf32>
    %5 = arith.cmpf ogt, %3, %4 : vector<1x64xf32>
    %6 = math.rsqrt %3 : vector<1x64xf32>
    %cst_2 = arith.constant 1.000000e+00 : f32
    %7 = vector.broadcast %cst_2 : f32 to vector<1x64xf32>
    %8 = arith.mulf %7, %6 : vector<1x64xf32>
    %cst_3 = arith.constant 1.000000e+00 : f32
    %9 = vector.broadcast %cst_3 : f32 to vector<1x64xf32>
    %10 = arith.select %5, %8, %9 : vector<1x64xi1>, vector<1x64xf32>
    %11 = vector.broadcast %10 : vector<1x64xf32> to vector<32x64xf32>
    %12 = arith.mulf %0, %11 : vector<32x64xf32>
    %13 = arith.truncf %12 : vector<32x64xf32> to vector<32x64xbf16>
    %c0_4 = arith.constant 0 : index
    %c0_5 = arith.constant 0 : index
    %14 = vector.load %arg2[%c0_4, %c0_5] : memref<32x64xbf16, #tpu.memory_space<vmem>>, vector<32x64xbf16>
    tpu.vector_store %arg2[%c0_4, %c0_5], %13 {strides = array<i32>} : memref<32x64xbf16, #tpu.memory_space<vmem>>, vector<32x64xbf16>,
    return
  }
  func.func @transform_0(%arg0: i32) -> (i32, i32) {
    %c0_i32 = arith.constant 0 : i32
    %c0_i32_0 = arith.constant 0 : i32
    return %c0_i32, %arg0 : i32, i32
  }
  func.func @transform_1(%arg0: i32) -> (i32, i32) {
    %c0_i32 = arith.constant 0 : i32
    %c0_i32_0 = arith.constant 0 : i32
    return %c0_i32, %arg0 : i32, i32
  }
}

module attributes {stable_mosaic.version = 11 : i64} {
  func.func @_hop_pred_kernel(%arg0: i32, %arg1: memref<4x32x128xbf16, #tpu.memory_space<vmem>>, %arg2: memref<32x128xbf16, #tpu.memory_space<vmem>>, %arg3: memref<32x128xbf16, #tpu.memory_space<vmem>>, %arg4: memref<1x128xf32, #tpu.memory_space<vmem>>) attributes {dimension_semantics = [#tpu.dimension_semantics<parallel>], iteration_bounds = array<i64: 2>, scalar_prefetch = 0 : i64, scratch_operands = 0 : i64, tpu.core_type = #tpu.core_type<tc>, window_params = [{transform_indices = @transform_0, window_bounds = array<i64: 4, 32, 128>}, {transform_indices = @transform_1, window_bounds = array<i64: 32, 128>}, {transform_indices = @transform_2, window_bounds = array<i64: 32, 128>}, {transform_indices = @transform_3, window_bounds = array<i64: 1, 128>}]} {
    %c0 = arith.constant 0 : index
    %c0_0 = arith.constant 0 : index
    %c0_1 = arith.constant 0 : index
    %0 = vector.load %arg1[%c0, %c0_0, %c0_1] : memref<4x32x128xbf16, #tpu.memory_space<vmem>>, vector<4x32x128xbf16>
    %1 = arith.extf %0 : vector<4x32x128xbf16> to vector<4x32x128xf32>
    %c0_2 = arith.constant 0 : index
    %c0_3 = arith.constant 0 : index
    %2 = vector.load %arg2[%c0_2, %c0_3] : memref<32x128xbf16, #tpu.memory_space<vmem>>, vector<32x128xbf16>
    %3 = arith.extf %2 : vector<32x128xbf16> to vector<32x128xf32>
    %c0_4 = arith.constant 0 : index
    %c0_5 = arith.constant 0 : index
    %4 = vector.load %arg3[%c0_4, %c0_5] : memref<32x128xbf16, #tpu.memory_space<vmem>>, vector<32x128xbf16>
    %5 = arith.extf %4 : vector<32x128xbf16> to vector<32x128xf32>
    %cst = arith.constant dense<0.000000e+00> : vector<32x128xf32>
    %6 = vector.multi_reduction <add>, %1, %cst [0] : vector<4x32x128xf32> to vector<32x128xf32>
    %7 = arith.mulf %6, %6 : vector<32x128xf32>
    %8 = arith.mulf %1, %1 : vector<4x32x128xf32>
    %cst_6 = arith.constant dense<0.000000e+00> : vector<32x128xf32>
    %9 = vector.multi_reduction <add>, %8, %cst_6 [0] : vector<4x32x128xf32> to vector<32x128xf32>
    %10 = arith.subf %7, %9 : vector<32x128xf32>
    %11 = arith.addf %10, %3 : vector<32x128xf32>
    %12 = arith.mulf %5, %11 : vector<32x128xf32>
    %cst_7 = arith.constant dense<0.000000e+00> : vector<128xf32>
    %13 = vector.multi_reduction <add>, %12, %cst_7 [0] : vector<32x128xf32> to vector<128xf32>
    %14 = vector.shape_cast %13 : vector<128xf32> to vector<1x128xf32>
    %cst_8 = arith.constant 0.000000e+00 : f32
    %15 = vector.broadcast %cst_8 : f32 to vector<1x128xf32>
    %16 = arith.subf %15, %14 : vector<1x128xf32>
    %17 = math.exp %16 : vector<1x128xf32>
    %cst_9 = arith.constant 1.000000e+00 : f32
    %18 = vector.broadcast %cst_9 : f32 to vector<1x128xf32>
    %19 = arith.addf %18, %17 : vector<1x128xf32>
    %cst_10 = arith.constant 1.000000e+00 : f32
    %20 = vector.broadcast %cst_10 : f32 to vector<1x128xf32>
    %21 = arith.divf %20, %19 : vector<1x128xf32>
    %c0_11 = arith.constant 0 : index
    %c0_12 = arith.constant 0 : index
    %22 = vector.load %arg4[%c0_11, %c0_12] : memref<1x128xf32, #tpu.memory_space<vmem>>, vector<1x128xf32>
    tpu.vector_store %arg4[%c0_11, %c0_12], %21 {strides = array<i32>} : memref<1x128xf32, #tpu.memory_space<vmem>>, vector<1x128xf32>,
    return
  }
  func.func @transform_0(%arg0: i32) -> (i32, i32, i32) {
    %c0_i32 = arith.constant 0 : i32
    %c0_i32_0 = arith.constant 0 : i32
    %c0_i32_1 = arith.constant 0 : i32
    return %c0_i32, %c0_i32_0, %arg0 : i32, i32, i32
  }
  func.func @transform_1(%arg0: i32) -> (i32, i32) {
    %c0_i32 = arith.constant 0 : i32
    %c0_i32_0 = arith.constant 0 : i32
    return %c0_i32, %arg0 : i32, i32
  }
  func.func @transform_2(%arg0: i32) -> (i32, i32) {
    %c0_i32 = arith.constant 0 : i32
    %c0_i32_0 = arith.constant 0 : i32
    return %c0_i32, %arg0 : i32, i32
  }
  func.func @transform_3(%arg0: i32) -> (i32, i32) {
    %c0_i32 = arith.constant 0 : i32
    %c0_i32_0 = arith.constant 0 : i32
    return %c0_i32, %arg0 : i32, i32
  }
}

</mosaic_0001>

<bundles_post_ra>
// kernel: gafm_item_forward.4
= control target key start
LH: loop header
LB: loop body
LE: loop exit
PB: predicated region body
PF: predicated region fallthrough
CT: control target
= control target key end

     0   :  { %6 = vsyncpa [#allocation3], 0  ;;  %s544_s0 = inlined_call_operand.hbm [shape: f32[32,500], index: 0, kind: input, shape index: {}]   ;;  %s545_s1 = inlined_call_operand.vmem [shape: bf16[32,500], index: 1, kind: output, shape index: {}]  }
   0x1   :  { %8 = vsyncpa [#allocation3 + $0x1], 0  ;;  %s443_s6 = smov 0   ;;  %s445_s7 = smov 0  }
   0x2   :  { %s447_s8 = smov 0   ;;  %s449_s9 = smov 0  }
   0x3 LB: > { %s462_s10 = sadd.s32 4294967295, %s428_s9   ;;  %s465_s11 = sadd.s32 1, %s428_s9   ;;  %s428_s9 = sphi %s449_s9, %s553_s9   ;;  %s424_s8 = sphi %s447_s8, %s552_s8   ;;  %s420_s7 = sphi %s445_s7, %s551_s7   ;;  %s416_s6 = sphi %s443_s6, %s550_s6  }
   0x4   : > { %s18_s12 = ssub.s32 %s428_s9, %s465_s11  ;;  %s21_s13 = sadd.s32 1, %s424_s8 }
   0x5   : > { %p19_p0 = scmp.eq.s32.totalorder %s18_s12, 0  ;;  %p28_p1 = scmp.ne.s32.totalorder %s424_s8, %s420_s7 }
   0x6   : > { %p29_p2 = scmp.eq.s32.totalorder %s428_s9, 0  ;;  %p34_p3 = scmp.ne.s32.totalorder %s420_s7, %s416_s6 }
   0x7   : > { %s475_s14 = scalar_select %p19_p0, %s424_s8, %s21_s13  }
   0x8   : > { %p477_p4 = por %p29_p2, %p28_p1  ;;  %p35_p5 = scmp.eq.s32.totalorder %s462_s10, 0 }
   0x9   : > { %p58_p6 = scmp.eq.s32.totalorder %s462_s10, 3  ;;  %p326_p8 = scmp.lt.s32.totalorder %s428_s9, 4 }
   0xa   : > { %p483_p7 = por %p35_p5, %p34_p3  ;;  %s84_s18 = sand.u32 1, %s424_s8  }
   0xb   : > { %p488_p9 = por %p58_p6, %p28_p1  ;;  %s300_s19 = sshll.u32 %s84_s18, 5 }
   0xc   : > { %s301_s20 = sshll.u32 %s428_s9, 3  ;;  %s88_s24 = scalar_lea.vmem [#allocation2], %s300_s19 }
   0xd   : > { %s92_s23 = scalar_lea.hbm %s544_s0, %s301_s20  ;;  %s95_s25 = sshll.u32 %s88_s24, 4  ;;  %s96_s25 = int_to_ptr.vmem [resolvable:$true] %s95_s25 }
   0xe   : > { %s93_s26 = sshll.u32 %s92_s23, 4  ;;  %p499_p10 = pnand %p326_p8, %p477_p4  ;;  %s94_s26 = int_to_ptr.hbm [resolvable:$true] %s93_s26 }
   0xf   : > { %s85_s28 = scalar_lea.sflag [#allocation3], %s84_s18  ;;  %s364_s29 = sshra.s32 %s94_s26, 4  ;;  %s365_s29 = int_to_ptr.hbm [resolvable:$true] %s364_s29 }
  0x10   : > { %s366_s30 = scalar_lea.hbm %s365_s29, 32  ;;  %p368_p12 = pneg %p499_p10 }
  0x11   : > { %p367_p11 = scmp.ne.s32.totalorder %s365_s29, %s366_s30  ;;  %s371_s4 = scalar_lea.hbm %s544_s0, 128 }
  0x12   : > { %p372_p1 = scmp.lt.s32.totalorder %s365_s29, %s544_s0  ;;  %p373_p2 = scmp.lt.s32.totalorder %s371_s4, %s366_s30 }
  0x13   : > { %p369_p13 = pnand %p368_p12, %p367_p11 }
  0x14   : > { %p374_p3 = por %p373_p2, %p372_p1 }
  0x15   : > { %p370_p0 = pneg %p369_p13 }
  0x17   : > { %p375_p4 = pnand %p374_p3, %p370_p0 }
  0x19   : > { %378 = shalt.err (!%p375_p4)
}
  0x1a   : > { %s430_s12 = smov 512   ;;  %s431_s13 = smov 128  }
  0x1b   : > { %s432_s15 = smov 8   ;;  %p302_p5 = scmp.ge.s32.totalorder %s428_s9, 1 }
  0x1c   : > { %325 = dma.hbm_to_vmem [thread:$0]  (!%p499_p10), %s94_s26, 512, %s96_s25, %s85_s28, %s430_s12, %s431_s13, %s432_s15  }
  0x1d   : > { %p103_p6 = scmp.lt.s32.totalorder %s428_s9, 5 }
  0x1f   : > { %p104_p8 = pnand %p302_p5, %p103_p6 }
  0x20   : > { %s516_s18 = sand.u32 (!%p104_p8), 1, %s420_s7  }
  0x21   : > { %107 = sbr.rel (%p104_p8) target bundleno = 95 (0x5f), region = 24  ;;  %s303_s19 = sshll.u32 (!%p104_p8), %s516_s18, 5 }
  0x22   : > { %s110_s20 = scalar_lea.sflag (!%p104_p8), [#allocation3], %s516_s18  ;;  %s113_s21 = scalar_lea.vmem (!%p104_p8), [#allocation2], %s303_s19 }
  0x26   : > { %411 = dma.done.wait (%p483_p7), %s110_s20, 512  }
  0x27   : > { %413 = vsyncadd (%p483_p7), %s110_s20, 4294966784  ;;  %v132_v0 = vld [vmem:[%s113_s21] sm:$0xff]  ;;  %v133_v1 = vld [vmem:[%s113_s21 + $0x8] sm:$0xff]  ;;  %s304_s9 = sshll.u32 %s516_s18, 4  ;;  %s306_s22 = sshll.u32 (%p488_p9), %s462_s10, 2 }
  0x28   : > { %v134_v2 = vld [vmem:[%s113_s21 + $0x10] sm:$0xff]  ;;  %v135_v3 = vld [vmem:[%s113_s21 + $0x18] sm:$0xff]  ;;  %v136_v4 = vmul.f32 %v132_v0, %v132_v0  ;;  %v137_v5 = vmul.f32 %v133_v1, %v133_v1  ;;  %s131_s16 = scalar_lea.vmem [#allocation4], %s304_s9  ;;  %s181_s25 = scalar_lea.vmem (%p488_p9), %s545_s1, %s306_s22 }
  0x29   : > { %v138_v6 = vmul.f32 %v134_v2, %v134_v2  ;;  %v139_v7 = vmul.f32 %v135_v3, %v135_v3 }
  0x2a   : > { %v140_v8 = vadd.f32 %v137_v5, %v136_v4 }
  0x2c   : > { %v141_v9 = vadd.f32 %v140_v8, %v138_v6 }
  0x2e   : > { %v142_v10 = vadd.f32 %v141_v9, %v139_v7 }
  0x30   : > { %v143_v11 = vrot.slane %v142_v10, 4 }
  0x32   : > { %v144_v12 = vadd.f32 %v143_v11, %v142_v10 }
  0x34   : > { %v145_v13 = vrot.slane %v144_v12, 2 }
  0x36   : > { %v146_v14 = vadd.f32 %v145_v13, %v144_v12 }
  0x38   : > { %v147_v15 = vrot.slane %v146_v14, 1 }
  0x3a   : > { %v148_v16 = vadd.f32 %v147_v15, %v146_v14 }
  0x3c   : > { %362 = vrsqrt.f32 %v148_v16  ;;  %vm156_vm0 = vweird.f32 %v148_v16  ;;  %vm149_vm3 = vcmp.gt.f32.partialorder %v148_v16, 1.0 }
  0x42   : > { %v363_v17 = vpop.eup %362 }
  0x43   : > { %v151_v18 = vmul.f32 %v363_v17, %v148_v16  ;;  %vm157_vm1 = vweird.f32 %v363_v17 }
  0x44   : > { %vm158_vm2 = vmor %vm156_vm0, %vm157_vm1 }
  0x45   : > { %v152_v19 = vmul.f32 %v363_v17, %v151_v18 }
  0x47   : > { %v153_v20 = vmul.f32 0.5, %v152_v19 }
  0x49   : > { %v154_v21 = vsub.f32 1.5, %v153_v20 }
  0x4b   : > { %v155_v22 = vmul.f32 %v363_v17, %v154_v21 }
  0x4d   : > { %v159_v23 = vsel %vm158_vm2, %v363_v17, %v155_v22 }
  0x4e   : > { %v160_v24 = vsel %vm149_vm3, %v159_v23, 1.0 }
  0x4f   : > { %v161_v25 = vmul.f32 %v160_v24, %v132_v0  ;;  %v162_v26 = vmul.f32 %v160_v24, %v133_v1  ;;  %v163_v27 = vmul.f32 %v160_v24, %v134_v2  ;;  %v164_v28 = vmul.f32 %v160_v24, %v135_v3 }
  0x50   : > { %179 = sbr.rel (!%p488_p9) target bundleno = 95 (0x5f), region = 32 }
  0x51   : > { %v312_v29 = vpack.c.bf16 %v162_v26, %v161_v25  ;;  %v317_v30 = vpack.c.bf16 %v164_v28, %v163_v27 }
  0x53   : > { %313 = vst [vmem:[%s131_s16] sm:$0xff] %v312_v29  }
  0x54   : > { %319 = vst [vmem:[%s131_s16 + $0x8] sm:$0xff] %v317_v30  }
  0x5a   : > { %v198_v31 = vld [vmem:[%s131_s16] sm:$0xf]  ;;  %v200_v32 = vld [vmem:[%s131_s16 + $0x4] sm:$0xf] }
  0x5b   : > { %v202_v33 = vld [vmem:[%s131_s16 + $0x8] sm:$0xf]  ;;  %199 = vst [vmem:[%s181_s25] sm:$0xf] %v198_v31  ;;  %v204_v34 = vld [vmem:[%s131_s16 + $0xc] sm:$0xf] }
  0x5c   : > { %201 = vst [vmem:[%s181_s25 + $0x10] sm:$0xf] %v200_v32 }
  0x5d   : > { %203 = vst [vmem:[%s181_s25 + $0x20] sm:$0xf] %v202_v33 }
  0x5e   : > { %205 = vst [vmem:[%s181_s25 + $0x30] sm:$0xf] %v204_v34 }
  0x5f PF: > { %p11_p7 = scmp.ge.s32.totalorder %s465_s11, 6   ;;  %s550_s6 = smov %s420_s7 }
  0x60   : > { %s551_s7 = smov %s424_s8  ;;  %s552_s8 = smov %s475_s14 }
  0x61   : > { %s553_s9 = smov %s465_s11  ;;  %13 = sbr.rel (!%p11_p7) target bundleno = 3 (0x3), region = 105 }
  0x66   :  { %247 = vsyncpa [#allocation3], 1 }
  0x67   :  { %249 = vsyncpa [#allocation3 + $0x1], 1 }

// kernel: gafm_item_forward.6
= control target key start
LH: loop header
LB: loop body
LE: loop exit
PB: predicated region body
PF: predicated region fallthrough
CT: control target
= control target key end

     0   :  { %s690_s9 = smov 0   ;;  %s692_s10 = smov 0   ;;  %s799_s0 = inlined_call_operand.vmem [shape: bf16[4,32,320], index: 0, kind: input, shape index: {}]   ;;  %s800_s1 = inlined_call_operand.vmem [shape: bf16[32,320], index: 1, kind: input, shape index: {}]   ;;  %s801_s2 = inlined_call_operand.vmem [shape: bf16[32,320], index: 2, kind: output, shape index: {}]  }
   0x1   :  { %s694_s11 = smov 0  }
   0x2 LB: > { %s552_s12 = sadd.s32 4294967295, %s673_s11   ;;  %s707_s13 = sadd.s32 1, %s673_s11   ;;  %s673_s11 = sphi %s694_s11, %s806_s11   ;;  %s669_s10 = sphi %s692_s10, %s805_s10   ;;  %s665_s9 = sphi %s690_s9, %s804_s9  }
   0x3   : > { %s16_s14 = ssub.s32 %s673_s11, %s707_s13  ;;  %s19_s15 = sadd.s32 1, %s669_s10 }
   0x4   : > { %p17_p0 = scmp.eq.s32.totalorder %s16_s14, 0  ;;  %p26_p1 = scmp.ne.s32.totalorder %s669_s10, %s665_s9 }
   0x5   : > { %p27_p2 = scmp.eq.s32.totalorder %s673_s11, 0  ;;  %p82_p3 = scmp.eq.s32.totalorder %s552_s12, 2 }
   0x6   : > { %s718_s16 = scalar_select %p17_p0, %s669_s10, %s19_s15  }
   0x7   : > { %p720_p4 = por %p27_p2, %p26_p1  ;;  %p724_p5 = por %p82_p3, %p26_p1 }
   0x8   : > { %p555_p6 = scmp.ge.s32.totalorder %s673_s11, 3 }
   0xa   : > { %104 = sbr.rel (%p555_p6) target bundleno = 43 (0x2b), region = 16 }
   0xf   : > { %107 = sbr.rel (!%p720_p4) target bundleno = 35 (0x23), region = 20  ;;  %s109_s19 = sand.u32 (%p720_p4), 1, %s669_s10  }
  0x10   : > { %s557_s20 = sshll.u32 (%p720_p4), %s673_s11, 2  ;;  %s556_s21 = sshll.u32 (%p720_p4), %s109_s19, 6 }
  0x11   : > { %s736_s24 = scalar_lea.vmem (%p720_p4), %s799_s0, %s557_s20  ;;  %s111_s25 = scalar_lea.vmem (%p720_p4), [#allocation2], %s556_s21 }
  0x12   : > { %v130_v0 = vld [vmem:[%s736_s24] sm:$0xf] (%p720_p4)  ;;  %v132_v1 = vld [vmem:[%s736_s24 + $0xc] sm:$0xf] (%p720_p4)  ;;  %v134_v2 = vld [vmem:[%s736_s24 + $0x18] sm:$0xf] (%p720_p4) }
  0x13   : > { %131 = vst [vmem:[%s111_s25] sm:$0xf] (%p720_p4), %v130_v0  ;;  %v136_v3 = vld [vmem:[%s736_s24 + $0x24] sm:$0xf] (%p720_p4)  ;;  %v138_v4 = vld [vmem:[%s736_s24 + $0x30] sm:$0xf] (%p720_p4) }
  0x14   : > { %133 = vst [vmem:[%s111_s25 + $0x4] sm:$0xf] %v132_v1  ;;  %v140_v5 = vld [vmem:[%s736_s24 + $0x3c] sm:$0xf]  ;;  %v142_v6 = vld [vmem:[%s736_s24 + $0x48] sm:$0xf] }
  0x15   : > { %135 = vst [vmem:[%s111_s25 + $0x8] sm:$0xf] %v134_v2  ;;  %v144_v7 = vld [vmem:[%s736_s24 + $0x54] sm:$0xf]  ;;  %v146_v8 = vld [vmem:[%s736_s24 + $0x60] sm:$0xf] }
  0x16   : > { %137 = vst [vmem:[%s111_s25 + $0xc] sm:$0xf] %v136_v3  ;;  %v148_v9 = vld [vmem:[%s736_s24 + $0x6c] sm:$0xf]  ;;  %v150_v10 = vld [vmem:[%s736_s24 + $0x78] sm:$0xf] }
  0x17   : > { %139 = vst [vmem:[%s111_s25 + $0x10] sm:$0xf] %v138_v4  ;;  %v152_v11 = vld [vmem:[%s736_s24 + $0x84] sm:$0xf]  ;;  %v154_v12 = vld [vmem:[%s736_s24 + $0x90] sm:$0xf] }
  0x18   : > { %141 = vst [vmem:[%s111_s25 + $0x14] sm:$0xf] %v140_v5  ;;  %v156_v13 = vld [vmem:[%s736_s24 + $0x9c] sm:$0xf]  ;;  %v158_v14 = vld [vmem:[%s736_s24 + $0xa8] sm:$0xf] }
  0x19   : > { %143 = vst [vmem:[%s111_s25 + $0x18] sm:$0xf] %v142_v6  ;;  %v160_v15 = vld [vmem:[%s736_s24 + $0xb4] sm:$0xf] }
  0x1a   : > { %145 = vst [vmem:[%s111_s25 + $0x1c] sm:$0xf] %v144_v7 }
  0x1b   : > { %147 = vst [vmem:[%s111_s25 + $0x20] sm:$0xf] %v146_v8 }
  0x1c   : > { %149 = vst [vmem:[%s111_s25 + $0x24] sm:$0xf] %v148_v9 }
  0x1d   : > { %151 = vst [vmem:[%s111_s25 + $0x28] sm:$0xf] %v150_v10 }
  0x1e   : > { %153 = vst [vmem:[%s111_s25 + $0x2c] sm:$0xf] %v152_v11 }
  0x1f   : > { %155 = vst [vmem:[%s111_s25 + $0x30] sm:$0xf] %v154_v12 }
  0x20   : > { %157 = vst [vmem:[%s111_s25 + $0x34] sm:$0xf] %v156_v13 }
  0x21   : > { %159 = vst [vmem:[%s111_s25 + $0x38] sm:$0xf] %v158_v14 }
  0x22   : > { %161 = vst [vmem:[%s111_s25 + $0x3c] sm:$0xf] %v160_v15 }
  0x23 PF: > { %217 = sbr.rel (!%p720_p4) target bundleno = 43 (0x2b), region = 61  ;;  %s219_s26 = sand.u32 (%p720_p4), 1, %s669_s10  }
  0x24   : > { %s559_s27 = sshll.u32 (%p720_p4), %s673_s11, 2  ;;  %s558_s28 = sshll.u32 (%p720_p4), %s219_s26, 4 }
  0x25   : > { %s223_s3 = scalar_lea.vmem (%p720_p4), %s800_s1, %s559_s27  ;;  %s221_s4 = scalar_lea.vmem (%p720_p4), [#allocation3], %s558_s28 }
  0x26   : > { %v240_v16 = vld [vmem:[%s223_s3] sm:$0xf] (%p720_p4)  ;;  %v242_v17 = vld [vmem:[%s223_s3 + $0xc] sm:$0xf] (%p720_p4)  ;;  %v244_v18 = vld [vmem:[%s223_s3 + $0x18] sm:$0xf] (%p720_p4) }
  0x27   : > { %241 = vst [vmem:[%s221_s4] sm:$0xf] (%p720_p4), %v240_v16  ;;  %v246_v19 = vld [vmem:[%s223_s3 + $0x24] sm:$0xf] (%p720_p4) }
  0x28   : > { %243 = vst [vmem:[%s221_s4 + $0x4] sm:$0xf] %v242_v17 }
  0x29   : > { %245 = vst [vmem:[%s221_s4 + $0x8] sm:$0xf] %v244_v18 }
  0x2a   : > { %247 = vst [vmem:[%s221_s4 + $0xc] sm:$0xf] %v246_v19 }
  0x2b PF: > { %p560_p7 = scmp.ge.s32.totalorder %s673_s11, 1  ;;  %p278_p8 = scmp.lt.s32.totalorder %s673_s11, 4 }
  0x2d   : > { %p279_p9 = pnand %p560_p7, %p278_p8 }
  0x2e   : > { %s285_s5 = sand.u32 (!%p279_p9), 1, %s665_s9  }
  0x2f   : > { %282 = sbr.rel (%p279_p9) target bundleno = 89 (0x59), region = 102  ;;  %s561_s6 = sshll.u32 (!%p279_p9), %s285_s5, 6 }
  0x30   : > { %s764_s7 = sshll.u32 (!%p279_p9), %s285_s5, 4  ;;  %s766_s8 = scalar_lea.vmem (!%p279_p9), [#allocation2], %s561_s6 }
  0x31   : > { %s294_s9 = scalar_lea.vmem (!%p279_p9), [#allocation3], %s764_s7  ;;  %s315_s14 = scalar_lea.vmem (!%p279_p9), [#allocation4], %s764_s7 }
  0x34   : > { %v569_v20 = vld [vmem:[%s766_s8] sm:$0xff]   ;;  %v619_v21 = vld [vmem:[%s766_s8 + $0x10] sm:$0xff]   ;;  %v618_v39 = vld [vmem:[%s766_s8 + $0x8] sm:$0xff]   ;;  %s565_s15 = sshll.u32 (%p724_p5), %s552_s12, 2 }
  0x35   : > { %v621_v22 = vld [vmem:[%s766_s8 + $0x20] sm:$0xff]   ;;  %v570_v23 = vunpack.c.l.bf16 %v569_v20  ;;  %v571_v24 = vunpack.c.h.bf16 %v569_v20  ;;  %v578_v25 = vunpack.c.l.bf16 %v619_v21  ;;  %v579_v26 = vunpack.c.h.bf16 %v619_v21  ;;  %v623_v27 = vld [vmem:[%s766_s8 + $0x30] sm:$0xff]   ;;  %v620_v44 = vld [vmem:[%s766_s8 + $0x18] sm:$0xff]   ;;  %s424_s20 = scalar_lea.vmem (%p724_p5), %s801_s2, %s565_s15 }
  0x36   : > { %v601_v28 = vld [vmem:[%s294_s9] sm:$0xff]   ;;  %v586_v29 = vunpack.c.l.bf16 %v621_v22  ;;  %v587_v30 = vunpack.c.h.bf16 %v621_v22  ;;  %v594_v31 = vunpack.c.l.bf16 %v623_v27  ;;  %v595_v32 = vunpack.c.h.bf16 %v623_v27  ;;  %v622_v49 = vld [vmem:[%s766_s8 + $0x28] sm:$0xff]   ;;  %v624_v54 = vld [vmem:[%s766_s8 + $0x38] sm:$0xff]  }
  0x37   : > { %v602_v33 = vunpack.c.l.bf16 %v601_v28  ;;  %v603_v34 = vunpack.c.h.bf16 %v601_v28  ;;  %v356_v35 = vadd.f32 %v578_v25, %v570_v23  ;;  %v359_v36 = vadd.f32 %v579_v26, %v571_v24 }
  0x38   : > { %v372_v37 = vmul.f32 %v570_v23, %v570_v23  ;;  %v373_v38 = vmul.f32 %v571_v24, %v571_v24  ;;  %v376_v40 = vmul.f32 %v578_v25, %v578_v25  ;;  %v377_v41 = vmul.f32 %v579_v26, %v579_v26  ;;  %v625_v25 = vld [vmem:[%s294_s9 + $0x8] sm:$0xff]  }
  0x39   : > { %v380_v42 = vmul.f32 %v586_v29, %v586_v29  ;;  %v381_v43 = vmul.f32 %v587_v30, %v587_v30  ;;  %v357_v45 = vadd.f32 %v586_v29, %v356_v35  ;;  %v360_v46 = vadd.f32 %v587_v30, %v359_v36 }
  0x3a   : > { %v384_v47 = vmul.f32 %v594_v31, %v594_v31  ;;  %v385_v48 = vmul.f32 %v595_v32, %v595_v32  ;;  %v388_v50 = vadd.f32 %v376_v40, %v372_v37  ;;  %v391_v51 = vadd.f32 %v377_v41, %v373_v38 }
  0x3b   : > { %v574_v52 = vunpack.c.l.bf16 %v618_v39  ;;  %v575_v53 = vunpack.c.h.bf16 %v618_v39  ;;  %v358_v55 = vadd.f32 %v594_v31, %v357_v45  ;;  %v361_v56 = vadd.f32 %v595_v32, %v360_v46 }
  0x3c   : > { %v582_v57 = vunpack.c.l.bf16 %v620_v44  ;;  %v583_v58 = vunpack.c.h.bf16 %v620_v44  ;;  %v389_v59 = vadd.f32 %v388_v50, %v380_v42  ;;  %v392_v60 = vadd.f32 %v391_v51, %v381_v43 }
  0x3d   : > { %v590_v61 = vunpack.c.l.bf16 %v622_v49  ;;  %v591_v62 = vunpack.c.h.bf16 %v622_v49  ;;  %v368_v63 = vmul.f32 %v358_v55, %v358_v55  ;;  %v369_v0 = vmul.f32 %v361_v56, %v361_v56 }
  0x3e   : > { %v598_v1 = vunpack.c.l.bf16 %v624_v54  ;;  %v599_v2 = vunpack.c.h.bf16 %v624_v54  ;;  %v390_v3 = vadd.f32 %v389_v59, %v384_v47  ;;  %v393_v4 = vadd.f32 %v392_v60, %v385_v48 }
  0x3f   : > { %v362_v5 = vadd.f32 %v582_v57, %v574_v52  ;;  %v365_v6 = vadd.f32 %v583_v58, %v575_v53  ;;  %v374_v7 = vmul.f32 %v574_v52, %v574_v52  ;;  %v375_v8 = vmul.f32 %v575_v53, %v575_v53 }
  0x40   : > { %v378_v9 = vmul.f32 %v582_v57, %v582_v57  ;;  %v379_v10 = vmul.f32 %v583_v58, %v583_v58  ;;  %v400_v11 = vsub.f32 %v368_v63, %v390_v3  ;;  %v401_v12 = vsub.f32 %v369_v0, %v393_v4 }
  0x41   : > { %v363_v13 = vadd.f32 %v590_v61, %v362_v5  ;;  %v366_v14 = vadd.f32 %v591_v62, %v365_v6  ;;  %v382_v15 = vmul.f32 %v590_v61, %v590_v61  ;;  %v383_v16 = vmul.f32 %v591_v62, %v591_v62 }
  0x42   : > { %v404_v17 = vadd.f32 %v602_v33, %v400_v11  ;;  %v405_v18 = vadd.f32 %v603_v34, %v401_v12  ;;  %v386_v21 = vmul.f32 %v598_v1, %v598_v1  ;;  %v387_v22 = vmul.f32 %v599_v2, %v599_v2 }
  0x43   : > { %v364_v19 = vadd.f32 %v598_v1, %v363_v13  ;;  %v367_v20 = vadd.f32 %v599_v2, %v366_v14  ;;  %v394_v23 = vadd.f32 %v378_v9, %v374_v7  ;;  %v397_v24 = vadd.f32 %v379_v10, %v375_v8 }
  0x44   : > { %v611_v26 = vpack.c.bf16 %v405_v18, %v404_v17  ;;  %v606_v31 = vunpack.c.l.bf16 %v625_v25  ;;  %v607_v32 = vunpack.c.h.bf16 %v625_v25 }
  0x45   : > { %v370_v27 = vmul.f32 %v364_v19, %v364_v19  ;;  %v371_v28 = vmul.f32 %v367_v20, %v367_v20  ;;  %v395_v29 = vadd.f32 %v394_v23, %v382_v15  ;;  %v398_v30 = vadd.f32 %v397_v24, %v383_v16 }
  0x46   : > { %612 = vst [vmem:[%s315_s14] sm:$0xff] %v611_v26  }
  0x47   : > { %v396_v35 = vadd.f32 %v395_v29, %v386_v21  ;;  %v399_v33 = vadd.f32 %v398_v30, %v387_v22 }
  0x49   : > { %v402_v34 = vsub.f32 %v370_v27, %v396_v35  ;;  %v403_v36 = vsub.f32 %v371_v28, %v399_v33 }
  0x4b   : > { %v406_v37 = vadd.f32 %v606_v31, %v402_v34  ;;  %v407_v38 = vadd.f32 %v607_v32, %v403_v36  ;;  %422 = sbr.rel (!%p724_p5) target bundleno = 89 (0x59), region = 114 }
  0x4d   : > { %v616_v39 = vpack.c.bf16 %v407_v38, %v406_v37  ;;  %v441_v40 = vld [vmem:[%s315_s14] sm:$0xf] (%p724_p5)  ;;  %v443_v41 = vld [vmem:[%s315_s14 + $0x4] sm:$0xf] (%p724_p5) }
  0x4e   : > { %442 = vst [vmem:[%s424_s20] sm:$0xf] (%p724_p5), %v441_v40 }
  0x4f   : > { %626 = vst [vmem:[%s315_s14 + $0x8] sm:$0xff] %v616_v39  }
  0x50   : > { %444 = vst [vmem:[%s424_s20 + $0xc] sm:$0xf] %v443_v41 }
  0x56   : > { %v445_v42 = vld [vmem:[%s315_s14 + $0x8] sm:$0xf]  ;;  %v447_v43 = vld [vmem:[%s315_s14 + $0xc] sm:$0xf] }
  0x57   : > { %446 = vst [vmem:[%s424_s20 + $0x18] sm:$0xf] %v445_v42 }
  0x58   : > { %448 = vst [vmem:[%s424_s20 + $0x24] sm:$0xf] %v447_v43 }
  0x59 PF: > { %p9_p10 = scmp.ge.s32.totalorder %s707_s13, 5   ;;  %s804_s9 = smov %s669_s10 }
  0x5a   : > { %s805_s10 = smov %s718_s16  ;;  %s806_s11 = smov %s707_s13 }
  0x5b   :  { %11 = sbr.rel (!%p9_p10) target bundleno = 2 (0x2), region = 194 }

// kernel: gafm_item_forward.5
= control target key start
LH: loop header
LB: loop body
LE: loop exit
PB: predicated region body
PF: predicated region fallthrough
CT: control target
= control target key end

     0   :  { %vm16_vm0 = vcmask 523264   ;;  %vm50_vm5 = vcmask 519168   ;;  %s95_s0 = inlined_call_operand.vmem [shape: f32[32,64], index: 0, kind: input, shape index: {}]   ;;  %s96_s1 = inlined_call_operand.vmem [shape: bf16[32,64], index: 1, kind: output, shape index: {}]  }
   0x1   :  { %v8_v0 = vld [vmem:[%s95_s0] sm:$0xff]  ;;  %v9_v1 = vld [vmem:[%s95_s0 + $0x8] sm:$0xff]  ;;  %v10_v2 = vld [vmem:[%s95_s0 + $0x10] sm:$0xff] }
   0x2   :  { %v11_v3 = vld [vmem:[%s95_s0 + $0x18] sm:$0xff]  ;;  %v12_v4 = vmul.f32 %v8_v0, %v8_v0  ;;  %v13_v5 = vmul.f32 %v9_v1, %v9_v1  ;;  %v14_v6 = vmul.f32 %v10_v2, %v10_v2 }
   0x3   :  { %v15_v7 = vmul.f32 %v11_v3, %v11_v3 }
   0x4   :  { %v17_v8 = vsel %vm16_vm0, %v12_v4, 0.0  ;;  %v18_v9 = vsel %vm16_vm0, %v13_v5, 0.0  ;;  %v20_v10 = vsel %vm16_vm0, %v14_v6, 0.0 }
   0x5   :  { %v19_v11 = vadd.f32 %v18_v9, %v17_v8  ;;  %v22_v12 = vsel %vm16_vm0, %v15_v7, 0.0 }
   0x7   :  { %v21_v13 = vadd.f32 %v20_v10, %v19_v11 }
   0x9   :  { %v23_v14 = vadd.f32 %v22_v12, %v21_v13 }
   0xb   :  { %v24_v15 = vrot.slane %v23_v14, 4 }
   0xd   :  { %v25_v16 = vadd.f32 %v24_v15, %v23_v14 }
   0xf   :  { %v26_v17 = vrot.slane %v25_v16, 2 }
  0x11   :  { %v27_v18 = vadd.f32 %v26_v17, %v25_v16 }
  0x13   :  { %v28_v19 = vrot.slane %v27_v18, 1 }
  0x15   :  { %v29_v20 = vadd.f32 %v28_v19, %v27_v18 }
  0x17   :  { %59 = vrsqrt.f32 %v29_v20  ;;  %vm37_vm1 = vweird.f32 %v29_v20  ;;  %vm30_vm4 = vcmp.gt.f32.partialorder %v29_v20, 1.0 }
  0x1d   :  { %v60_v21 = vpop.eup %59 }
  0x1e   :  { %v32_v22 = vmul.f32 %v60_v21, %v29_v20  ;;  %vm38_vm2 = vweird.f32 %v60_v21 }
  0x1f   :  { %vm39_vm3 = vmor %vm37_vm1, %vm38_vm2 }
  0x20   :  { %v33_v23 = vmul.f32 %v60_v21, %v32_v22 }
  0x22   :  { %v34_v24 = vmul.f32 0.5, %v33_v23 }
  0x24   :  { %v35_v25 = vsub.f32 1.5, %v34_v24 }
  0x26   :  { %v36_v26 = vmul.f32 %v60_v21, %v35_v25 }
  0x28   :  { %v40_v27 = vsel %vm39_vm3, %v60_v21, %v36_v26 }
  0x29   :  { %v41_v28 = vsel %vm30_vm4, %v40_v27, 1.0 }
  0x2a   :  { %v42_v29 = vmul.f32 %v41_v28, %v8_v0  ;;  %v43_v30 = vmul.f32 %v41_v28, %v9_v1  ;;  %v44_v31 = vmul.f32 %v41_v28, %v10_v2  ;;  %v45_v32 = vmul.f32 %v41_v28, %v11_v3 }
  0x2c   :  { %v46_v33 = vpack.c.bf16 %v42_v29, %v42_v29  ;;  %v47_v34 = vpack.c.bf16 %v43_v30, %v43_v30  ;;  %v48_v35 = vpack.c.bf16 %v44_v31, %v44_v31  ;;  %v49_v36 = vpack.c.bf16 %v45_v32, %v45_v32 }
  0x2e   :  { %51 = vst.msk [vmem:[%s96_s1] sm:$0xf] %vm50_vm5, %v46_v33 }
  0x2f   :  { %52 = vst.msk [vmem:[%s96_s1 + $0x4] sm:$0xf] %vm50_vm5, %v47_v34 }
  0x30   :  { %53 = vst.msk [vmem:[%s96_s1 + $0x8] sm:$0xf] %vm50_vm5, %v48_v35 }
  0x31   :  { %54 = vst.msk [vmem:[%s96_s1 + $0xc] sm:$0xf] %vm50_vm5, %v49_v36 }

// kernel: gafm_item_forward.7
= control target key start
LH: loop header
LB: loop body
LE: loop exit
PB: predicated region body
PF: predicated region fallthrough
CT: control target
= control target key end

     0   :  { %8 = vsyncpa [#allocation6], 0  ;;  %s1001_s0 = inlined_call_operand.vmem [shape: bf16[4,32,256], index: 0, kind: input, shape index: {}]   ;;  %s1002_s1 = inlined_call_operand.vmem [shape: bf16[32,256], index: 1, kind: input, shape index: {}]   ;;  %s1003_s2 = inlined_call_operand.vmem [shape: bf16[32,256], index: 2, kind: input, shape index: {}]   ;;  %s1004_s3 = inlined_call_operand.hbm [shape: f32[1,256], index: 3, kind: output, shape index: {}]  }
   0x1   :  { %10 = vsyncpa [#allocation6 + $0x1], 0  ;;  %s863_s12 = smov 0   ;;  %s865_s13 = smov 0  }
   0x2   :  { %s867_s14 = smov 0   ;;  %s869_s15 = smov 0  }
   0x3 LB: > { %s663_s16 = sadd.s32 4294967295, %s841_s15   ;;  %s664_s17 = sadd.s32 4294967294, %s841_s15   ;;  %s841_s15 = sphi %s869_s15, %s1011_s15   ;;  %s837_s14 = sphi %s867_s14, %s1010_s14   ;;  %s833_s13 = sphi %s865_s13, %s1009_s13   ;;  %s829_s12 = sphi %s863_s12, %s1008_s12  }
   0x4   : > { %s886_s18 = sadd.s32 1, %s841_s15   ;;  %s23_s19 = sadd.s32 1, %s837_s14 }
   0x5   : > { %s20_s20 = ssub.s32 %s841_s15, %s886_s18  ;;  %p30_p0 = scmp.ne.s32.totalorder %s837_s14, %s833_s13 }
   0x6   : > { %p21_p1 = scmp.eq.s32.totalorder %s20_s20, 0  ;;  %p31_p2 = scmp.eq.s32.totalorder %s841_s15, 0 }
   0x7   : > { %p112_p3 = scmp.eq.s32.totalorder %s663_s16, 1  ;;  %p117_p4 = scmp.ne.s32.totalorder %s833_s13, %s829_s12 }
   0x8   : > { %s899_s21 = scalar_select %p21_p1, %s837_s14, %s23_s19  }
   0x9   : > { %p901_p5 = por %p31_p2, %p30_p0  ;;  %p905_p6 = por %p112_p3, %p30_p0 }
   0xa   : > { %p118_p7 = scmp.eq.s32.totalorder %s664_s17, 1  ;;  %p666_p9 = scmp.ge.s32.totalorder %s841_s15, 2 }
   0xc   : > { %p909_p8 = por %p118_p7, %p117_p4  ;;  %134 = sbr.rel (%p666_p9) target bundleno = 53 (0x35), region = 16 }
  0x11   : > { %137 = sbr.rel (!%p901_p5) target bundleno = 37 (0x25), region = 20  ;;  %s139_s25 = sand.u32 (%p901_p5), 1, %s837_s14  }
  0x12   : > { %s668_s26 = sshll.u32 (%p901_p5), %s841_s15, 2  ;;  %s667_s27 = sshll.u32 (%p901_p5), %s139_s25, 6 }
  0x13   : > { %s923_s30 = scalar_lea.vmem (%p901_p5), %s1001_s0, %s668_s26  ;;  %s141_s4 = scalar_lea.vmem (%p901_p5), [#allocation2], %s667_s27 }
  0x14   : > { %v160_v0 = vld [vmem:[%s923_s30] sm:$0xf] (%p901_p5)  ;;  %v162_v1 = vld [vmem:[%s923_s30 + $0x8] sm:$0xf] (%p901_p5)  ;;  %v164_v2 = vld [vmem:[%s923_s30 + $0x10] sm:$0xf] (%p901_p5) }
  0x15   : > { %161 = vst [vmem:[%s141_s4] sm:$0xf] (%p901_p5), %v160_v0  ;;  %v166_v3 = vld [vmem:[%s923_s30 + $0x18] sm:$0xf] (%p901_p5)  ;;  %v168_v4 = vld [vmem:[%s923_s30 + $0x20] sm:$0xf] (%p901_p5) }
  0x16   : > { %163 = vst [vmem:[%s141_s4 + $0x4] sm:$0xf] %v162_v1  ;;  %v170_v5 = vld [vmem:[%s923_s30 + $0x28] sm:$0xf]  ;;  %v172_v6 = vld [vmem:[%s923_s30 + $0x30] sm:$0xf] }
  0x17   : > { %165 = vst [vmem:[%s141_s4 + $0x8] sm:$0xf] %v164_v2  ;;  %v174_v7 = vld [vmem:[%s923_s30 + $0x38] sm:$0xf]  ;;  %v176_v8 = vld [vmem:[%s923_s30 + $0x40] sm:$0xf] }
  0x18   : > { %167 = vst [vmem:[%s141_s4 + $0xc] sm:$0xf] %v166_v3  ;;  %v178_v9 = vld [vmem:[%s923_s30 + $0x48] sm:$0xf]  ;;  %v180_v10 = vld [vmem:[%s923_s30 + $0x50] sm:$0xf] }
  0x19   : > { %169 = vst [vmem:[%s141_s4 + $0x10] sm:$0xf] %v168_v4  ;;  %v182_v11 = vld [vmem:[%s923_s30 + $0x58] sm:$0xf]  ;;  %v184_v12 = vld [vmem:[%s923_s30 + $0x60] sm:$0xf] }
  0x1a   : > { %171 = vst [vmem:[%s141_s4 + $0x14] sm:$0xf] %v170_v5  ;;  %v186_v13 = vld [vmem:[%s923_s30 + $0x68] sm:$0xf]  ;;  %v188_v14 = vld [vmem:[%s923_s30 + $0x70] sm:$0xf] }
  0x1b   : > { %173 = vst [vmem:[%s141_s4 + $0x18] sm:$0xf] %v172_v6  ;;  %v190_v15 = vld [vmem:[%s923_s30 + $0x78] sm:$0xf] }
  0x1c   : > { %175 = vst [vmem:[%s141_s4 + $0x1c] sm:$0xf] %v174_v7 }
  0x1d   : > { %177 = vst [vmem:[%s141_s4 + $0x20] sm:$0xf] %v176_v8 }
  0x1e   : > { %179 = vst [vmem:[%s141_s4 + $0x24] sm:$0xf] %v178_v9 }
  0x1f   : > { %181 = vst [vmem:[%s141_s4 + $0x28] sm:$0xf] %v180_v10 }
  0x20   : > { %183 = vst [vmem:[%s141_s4 + $0x2c] sm:$0xf] %v182_v11 }
  0x21   : > { %185 = vst [vmem:[%s141_s4 + $0x30] sm:$0xf] %v184_v12 }
  0x22   : > { %187 = vst [vmem:[%s141_s4 + $0x34] sm:$0xf] %v186_v13 }
  0x23   : > { %189 = vst [vmem:[%s141_s4 + $0x38] sm:$0xf] %v188_v14 }
  0x24   : > { %191 = vst [vmem:[%s141_s4 + $0x3c] sm:$0xf] %v190_v15 }
  0x25 PF: > { %247 = sbr.rel (!%p901_p5) target bundleno = 45 (0x2d), region = 61  ;;  %s249_s5 = sand.u32 (%p901_p5), 1, %s837_s14  }
  0x26   : > { %s670_s6 = sshll.u32 (%p901_p5), %s841_s15, 2  ;;  %s669_s7 = sshll.u32 (%p901_p5), %s249_s5, 4 }
  0x27   : > { %s253_s10 = scalar_lea.vmem (%p901_p5), %s1002_s1, %s670_s6  ;;  %s251_s11 = scalar_lea.vmem (%p901_p5), [#allocation3], %s669_s7 }
  0x28   : > { %v270_v16 = vld [vmem:[%s253_s10] sm:$0xf] (%p901_p5)  ;;  %v272_v17 = vld [vmem:[%s253_s10 + $0x8] sm:$0xf] (%p901_p5)  ;;  %v274_v18 = vld [vmem:[%s253_s10 + $0x10] sm:$0xf] (%p901_p5) }
  0x29   : > { %271 = vst [vmem:[%s251_s11] sm:$0xf] (%p901_p5), %v270_v16  ;;  %v276_v19 = vld [vmem:[%s253_s10 + $0x18] sm:$0xf] (%p901_p5) }
  0x2a   : > { %273 = vst [vmem:[%s251_s11 + $0x4] sm:$0xf] %v272_v17 }
  0x2b   : > { %275 = vst [vmem:[%s251_s11 + $0x8] sm:$0xf] %v274_v18 }
  0x2c   : > { %277 = vst [vmem:[%s251_s11 + $0xc] sm:$0xf] %v276_v19 }
  0x2d PF: > { %309 = sbr.rel (!%p901_p5) target bundleno = 53 (0x35), region = 102  ;;  %s311_s17 = sand.u32 (%p901_p5), 1, %s837_s14  }
  0x2e   : > { %s672_s19 = sshll.u32 (%p901_p5), %s841_s15, 2  ;;  %s671_s20 = sshll.u32 (%p901_p5), %s311_s17, 4 }
  0x2f   : > { %s315_s27 = scalar_lea.vmem (%p901_p5), %s1003_s2, %s672_s19  ;;  %s313_s28 = scalar_lea.vmem (%p901_p5), [#allocation4], %s671_s20 }
  0x30   : > { %v332_v20 = vld [vmem:[%s315_s27] sm:$0xf] (%p901_p5)  ;;  %v334_v21 = vld [vmem:[%s315_s27 + $0x8] sm:$0xf] (%p901_p5)  ;;  %v336_v22 = vld [vmem:[%s315_s27 + $0x10] sm:$0xf] (%p901_p5) }
  0x31   : > { %333 = vst [vmem:[%s313_s28] sm:$0xf] (%p901_p5), %v332_v20  ;;  %v338_v23 = vld [vmem:[%s315_s27 + $0x18] sm:$0xf] (%p901_p5) }
  0x32   : > { %335 = vst [vmem:[%s313_s28 + $0x4] sm:$0xf] %v334_v21 }
  0x33   : > { %337 = vst [vmem:[%s313_s28 + $0x8] sm:$0xf] %v336_v22 }
  0x34   : > { %339 = vst [vmem:[%s313_s28 + $0xc] sm:$0xf] %v338_v23 }
  0x35 PF: > { %p673_p10 = scmp.ge.s32.totalorder %s841_s15, 1  ;;  %p370_p11 = scmp.lt.s32.totalorder %s841_s15, 3 }
  0x37   : > { %p371_p12 = pnand %p673_p10, %p370_p11 }
  0x38   : > { %s958_s22 = sand.u32 (!%p371_p12), 1, %s833_s13   ;;  %s563_s9 = scalar_lea.hbm (!%p371_p12), %s1004_s3, %s663_s16 }
  0x39   : > { %374 = sbr.rel (%p371_p12) target bundleno = 137 (0x89), region = 143  ;;  %s674_s29 = sshll.u32 (!%p371_p12), %s958_s22, 6 }
  0x3a   : > { %s379_s30 = scalar_lea.vmem (!%p371_p12), [#allocation2], %s674_s29  ;;  %s675_s4 = sshll.u32 (!%p371_p12), %s958_s22, 4 }
  0x3b   : > { %s386_s5 = scalar_lea.vmem (!%p371_p12), [#allocation3], %s675_s4  ;;  %s393_s6 = scalar_lea.vmem (!%p371_p12), [#allocation4], %s675_s4 }
  0x3c   : > { %s420_s10 = scalar_lea.vmem (!%p371_p12), [#allocation5], %s958_s22  ;;  %s567_s17 = sshll.u32 (!%p371_p12), %s563_s9, 4  ;;  %s568_s17 = int_to_ptr.hbm [resolvable:$true] %s567_s17 }
  0x3d   : > { %s565_s11 = sshll.u32 (!%p371_p12), %s420_s10, 4  ;;  %s555_s19 = scalar_lea.sflag (!%p371_p12), [#allocation6], %s958_s22  ;;  %s566_s11 = int_to_ptr.vmem [resolvable:$true] %s565_s11 }
  0x3e   : > { %v680_v24 = vld [vmem:[%s379_s30] sm:$0xff]   ;;  %v727_v25 = vld [vmem:[%s379_s30 + $0x8] sm:$0xff]   ;;  %v728_v26 = vld [vmem:[%s379_s30 + $0x10] sm:$0xff]   ;;  %s793_s20 = sshra.s32 %s568_s17, 4  ;;  %s799_s27 = scalar_lea.hbm %s1004_s3, 2  ;;  %s794_s20 = int_to_ptr.hbm [resolvable:$true] %s793_s20 }
  0x3f   : > { %v729_v27 = vld [vmem:[%s379_s30 + $0x18] sm:$0xff]   ;;  %v681_v28 = vunpack.c.l.bf16 %v680_v24  ;;  %v682_v29 = vunpack.c.h.bf16 %v680_v24  ;;  %v685_v30 = vunpack.c.l.bf16 %v727_v25  ;;  %v686_v31 = vunpack.c.h.bf16 %v727_v25  ;;  %v730_v32 = vld [vmem:[%s379_s30 + $0x20] sm:$0xff]   ;;  %v731_v33 = vld [vmem:[%s379_s30 + $0x28] sm:$0xff]   ;;  %s795_s25 = scalar_lea.hbm %s794_s20, 1  ;;  %p800_p2 = scmp.lt.s32.totalorder %s794_s20, %s1004_s3 }
  0x40   : > { %v689_v34 = vunpack.c.l.bf16 %v728_v26  ;;  %v690_v35 = vunpack.c.h.bf16 %v728_v26  ;;  %v693_v36 = vunpack.c.l.bf16 %v729_v27  ;;  %v694_v37 = vunpack.c.h.bf16 %v729_v27  ;;  %v732_v42 = vld [vmem:[%s379_s30 + $0x30] sm:$0xff]   ;;  %v733_v43 = vld [vmem:[%s379_s30 + $0x38] sm:$0xff]   ;;  %p796_p13 = scmp.ne.s32.totalorder %s794_s20, %s795_s25  ;;  %p801_p3 = scmp.lt.s32.totalorder %s799_s27, %s795_s25 }
  0x41   : > { %v697_v38 = vunpack.c.l.bf16 %v730_v32  ;;  %v698_v39 = vunpack.c.h.bf16 %v730_v32  ;;  %v701_v40 = vunpack.c.l.bf16 %v731_v33  ;;  %v702_v41 = vunpack.c.h.bf16 %v731_v33  ;;  %v712_v12 = vld [vmem:[%s386_s5] sm:$0xff]   ;;  %v734_v13 = vld [vmem:[%s386_s5 + $0x8] sm:$0xff]  }
  0x42   : > { %v469_v44 = vadd.f32 %v689_v34, %v681_v28  ;;  %v472_v45 = vadd.f32 %v690_v35, %v682_v29  ;;  %v475_v46 = vadd.f32 %v693_v36, %v685_v30  ;;  %v478_v47 = vadd.f32 %v694_v37, %v686_v31  ;;  %v720_v22 = vld [vmem:[%s393_s6] sm:$0xff]   ;;  %v735_v23 = vld [vmem:[%s393_s6 + $0x8] sm:$0xff]   ;;  %p797_p0 = pnand %p796_p13, %p905_p6  ;;  %p802_p4 = por %p801_p3, %p800_p2 }
  0x43   : > { %v705_v48 = vunpack.c.l.bf16 %v732_v42  ;;  %v706_v49 = vunpack.c.h.bf16 %v732_v42  ;;  %v709_v50 = vunpack.c.l.bf16 %v733_v43  ;;  %v710_v51 = vunpack.c.h.bf16 %v733_v43 }
  0x44   : > { %v470_v52 = vadd.f32 %v697_v38, %v469_v44  ;;  %v473_v53 = vadd.f32 %v698_v39, %v472_v45  ;;  %v476_v54 = vadd.f32 %v701_v40, %v475_v46  ;;  %v479_v55 = vadd.f32 %v702_v41, %v478_v47  ;;  %p798_p1 = pneg %p797_p0 }
  0x45   : > { %v485_v56 = vmul.f32 %v681_v28, %v681_v28  ;;  %v486_v57 = vmul.f32 %v682_v29, %v682_v29  ;;  %v487_v58 = vmul.f32 %v685_v30, %v685_v30  ;;  %v488_v59 = vmul.f32 %v686_v31, %v686_v31 }
  0x46   : > { %v489_v60 = vmul.f32 %v689_v34, %v689_v34  ;;  %v490_v61 = vmul.f32 %v690_v35, %v690_v35  ;;  %v491_v62 = vmul.f32 %v693_v36, %v693_v36  ;;  %v492_v63 = vmul.f32 %v694_v37, %v694_v37  ;;  %p803_p5 = pnand %p802_p4, %p798_p1 }
  0x47   : > { %v471_v0 = vadd.f32 %v705_v48, %v470_v52  ;;  %v474_v1 = vadd.f32 %v706_v49, %v473_v53  ;;  %v477_v2 = vadd.f32 %v709_v50, %v476_v54  ;;  %v480_v3 = vadd.f32 %v710_v51, %v479_v55 }
  0x48   : > { %v493_v4 = vmul.f32 %v697_v38, %v697_v38  ;;  %v494_v5 = vmul.f32 %v698_v39, %v698_v39  ;;  %v495_v6 = vmul.f32 %v701_v40, %v701_v40  ;;  %v496_v7 = vmul.f32 %v702_v41, %v702_v41 }
  0x49   : > { %v497_v8 = vmul.f32 %v705_v48, %v705_v48  ;;  %v498_v9 = vmul.f32 %v706_v49, %v706_v49  ;;  %v499_v10 = vmul.f32 %v709_v50, %v709_v50  ;;  %v500_v11 = vmul.f32 %v710_v51, %v710_v51 }
  0x4a   : > { %v501_v14 = vadd.f32 %v489_v60, %v485_v56  ;;  %v504_v15 = vadd.f32 %v490_v61, %v486_v57  ;;  %v507_v16 = vadd.f32 %v491_v62, %v487_v58  ;;  %v510_v17 = vadd.f32 %v492_v63, %v488_v59 }
  0x4b   : > { %v481_v18 = vmul.f32 %v471_v0, %v471_v0  ;;  %v482_v19 = vmul.f32 %v474_v1, %v474_v1  ;;  %v483_v20 = vmul.f32 %v477_v2, %v477_v2  ;;  %v484_v21 = vmul.f32 %v480_v3, %v480_v3 }
  0x4c   : > { %v502_v24 = vadd.f32 %v501_v14, %v493_v4  ;;  %v505_v25 = vadd.f32 %v504_v15, %v494_v5  ;;  %v508_v26 = vadd.f32 %v507_v16, %v495_v6  ;;  %v511_v27 = vadd.f32 %v510_v17, %v496_v7 }
  0x4d   : > { %v713_v28 = vunpack.c.l.bf16 %v712_v12  ;;  %v714_v29 = vunpack.c.h.bf16 %v712_v12  ;;  %v717_v30 = vunpack.c.l.bf16 %v734_v13  ;;  %v718_v31 = vunpack.c.h.bf16 %v734_v13 }
  0x4e   : > { %v503_v32 = vadd.f32 %v502_v24, %v497_v8  ;;  %v506_v33 = vadd.f32 %v505_v25, %v498_v9  ;;  %v509_v34 = vadd.f32 %v508_v26, %v499_v10  ;;  %v512_v35 = vadd.f32 %v511_v27, %v500_v11 }
  0x4f   : > { %v721_v36 = vunpack.c.l.bf16 %v720_v22  ;;  %v722_v37 = vunpack.c.h.bf16 %v720_v22  ;;  %v725_v38 = vunpack.c.l.bf16 %v735_v23  ;;  %v726_v43 = vunpack.c.h.bf16 %v735_v23 }
  0x50   : > { %v513_v39 = vsub.f32 %v481_v18, %v503_v32  ;;  %v514_v40 = vsub.f32 %v482_v19, %v506_v33  ;;  %v515_v41 = vsub.f32 %v483_v20, %v509_v34  ;;  %v516_v42 = vsub.f32 %v484_v21, %v512_v35 }
  0x52   : > { %v517_v44 = vadd.f32 %v713_v28, %v513_v39  ;;  %v518_v45 = vadd.f32 %v714_v29, %v514_v40  ;;  %v519_v46 = vadd.f32 %v717_v30, %v515_v41  ;;  %v520_v47 = vadd.f32 %v718_v31, %v516_v42 }
  0x54   : > { %v521_v48 = vmul.f32 %v721_v36, %v517_v44  ;;  %v522_v49 = vmul.f32 %v722_v37, %v518_v45  ;;  %v523_v50 = vmul.f32 %v725_v38, %v519_v46  ;;  %v524_v51 = vmul.f32 %v726_v43, %v520_v47 }
  0x56   : > { %v525_v52 = vadd.f32 %v522_v49, %v521_v48 }
  0x58   : > { %v526_v53 = vadd.f32 %v525_v52, %v523_v50 }
  0x5a   : > { %v527_v54 = vadd.f32 %v526_v53, %v524_v51 }
  0x5c   : > { %v528_v55 = vrot.slane %v527_v54, 4 }
  0x5e   : > { %v529_v56 = vadd.f32 %v528_v55, %v527_v54 }
  0x60   : > { %v530_v57 = vrot.slane %v529_v56, 2 }
  0x62   : > { %v531_v58 = vadd.f32 %v530_v57, %v529_v56 }
  0x64   : > { %v532_v59 = vrot.slane %v531_v58, 1 }
  0x66   : > { %v533_v60 = vadd.f32 %v532_v59, %v531_v58 }
  0x68   : > { %v534_v61 = vsub.f32 0.0, %v533_v60 }
  0x6a   : > { %v535_v62 = vmul.f32 1.442695, %v534_v61 }
  0x6c   : > { %775 = vpow2.f32 %v535_v62 }
  0x72   : > { %v776_v63 = vpop.eup %775 }
  0x73   : > { %v537_v0 = vadd.f32 1.0, %v776_v63 }
  0x75   : > { %777 = vrcp.f32 %v537_v0  ;;  %v549_v3 = vand.u32 2147483648, %v537_v0  ;;  %vm543_vm0 = vweird.f32 %v537_v0  ;;  %v547_v5 = vand.u32 2147483647, %v537_v0 }
  0x77   : > { %v550_v7 = vor.u32 1.1754944e-38, %v549_v3  ;;  %vm548_vm3 = vcmp.eq.f32.partialorder %v547_v5, 8.507059e+37 }
  0x7b   : > { %v778_v1 = vpop.eup %777 }
  0x7c   : > { %v539_v2 = vmul.f32 %v778_v1, %v537_v0  ;;  %vm544_vm1 = vweird.f32 %v778_v1 }
  0x7d   : > { %vm545_vm2 = vmor %vm543_vm0, %vm544_vm1 }
  0x7e   : > { %v540_v4 = vsub.f32 1.0, %v539_v2 }
  0x80   : > { %v541_v6 = vmul.f32 %v778_v1, %v540_v4 }
  0x82   : > { %v542_v8 = vadd.f32 %v778_v1, %v541_v6 }
  0x84   : > { %v546_v9 = vsel %vm545_vm2, %v778_v1, %v542_v8 }
  0x85   : > { %v551_v10 = vsel %vm548_vm3, %v550_v7, %v546_v9 }
  0x86   : > { %553 = vst [vmem:[%s420_s10] sm:$0x1] %v551_v10 }
  0x87   : > { %806 = shalt.err (!%p803_p5)
}
  0x88   : > { %736 = dma.vmem_to_hbm [thread:$0]  (%p905_p6), %s566_s11, 16, %s568_s17, %s555_s19  }
  0x89 PF: > { %s579_s22 = sand.u32 1, %s829_s12   ;;  %p739_p7 = pnand %p666_p9, %p909_p8 }
  0x8a   : > { %s580_s30 = scalar_lea.sflag [#allocation6], %s579_s22 }
  0x8b   : > { %p740_p10 = pneg %p739_p7 }
  0x8d   : > { %824 = dma.done.wait (%p740_p10), %s580_s30, 16  }
  0x8e   : > { %826 = vsyncadd (%p740_p10), %s580_s30, 4294967280  ;;  %p13_p11 = scmp.ge.s32.totalorder %s886_s18, 4   ;;  %s1008_s12 = smov %s833_s13 }
  0x8f   : > { %s1009_s13 = smov %s837_s14  ;;  %s1010_s14 = smov %s899_s21 }
  0x90   : > { %s1011_s15 = smov %s886_s18  ;;  %15 = sbr.rel (!%p13_p11) target bundleno = 3 (0x3), region = 211 }
  0x95   :  { %585 = vsyncpa [#allocation6], 1 }
  0x96   :  { %587 = vsyncpa [#allocation6 + $0x1], 1 }

</bundles_post_ra>
